<compile_context>
chip_gen: v6e
topology: v6e:2x2x1
jax: 0.10.0
libtpu: 0.0.40
codegen_flags: <defaults>
</compile_context>

<pallas_src>
import numpy as np
import jax
import jax.numpy as jnp
from jax import lax
from jax.experimental import pallas as pl
from jax.experimental.pallas import tpu as pltpu


def _unit_rows_from_logits(x):
    """L2-normalized softmax(x) without the softmax denominator.

    softmax(x) = e / sum(e)  and  l2_normalize(v) is scale-invariant, so
    l2_normalize(softmax(x)) == e * rsqrt(sum(e*e)) with e = exp(x - max(x)).
    """
    m = jnp.max(x, axis=-1, keepdims=True)
    e = jnp.exp(x - m)
    return e * lax.rsqrt(jnp.sum(e * e, axis=-1, keepdims=True))


def dino_loss_kernel(params_ref,              # SMEM (7,) f32
                     s_ref, t_ref, c_ref,     # VMEM (4,tm,D), (4,tm,D), (1,D)
                     loss_ref, center_ref):   # VMEM (1,128) f32, (1,D) f32
    i = pl.program_id(0)

    inv_student_temp = params_ref[0]
    inv_teacher_temp = params_ref[1]
    inv_nce_temp = params_ref[2]
    momentum = params_ref[3]
    one_minus_momentum = params_ref[4]
    loss_scale = params_ref[5]        # 0.5 / rows_per_crop
    inv_center_count = params_ref[6]  # 1 / (4 * rows_per_crop * world_size)

    @pl.when(i == 0)
    def _init():
        loss_ref[...] = jnp.zeros_like(loss_ref)
        center_ref[...] = jnp.zeros_like(center_ref)

    c = c_ref[...].astype(jnp.float32)                           # (1, D)

    # Per-crop tiles of this row-tile (upcast once; inputs may be bf16).
    s_raw = [s_ref[k].astype(jnp.float32) for k in range(4)]     # each (tm, D)
    t_raw = [t_ref[k].astype(jnp.float32) for k in range(4)]

    # Normalized (softmax -> L2) rows used by InfoNCE.
    s_p = [_unit_rows_from_logits(x * inv_student_temp) for x in s_raw]
    t_p = [_unit_rows_from_logits((x - c) * inv_teacher_temp) for x in t_raw]

    def row_dot(a, b):
        return jnp.sum(a * b, axis=-1, keepdims=True)            # (tm, 1)

    def info_nce_rows(q, pos, neg1, neg2):
        # paired InfoNCE, label 0 -> per-row CE = logsumexp(logits) - logits[0]
        l0 = row_dot(q, pos) * inv_nce_temp
        l1 = row_dot(q, neg1) * inv_nce_temp
        l2 = row_dot(q, neg2) * inv_nce_temp
        m = jnp.maximum(l0, jnp.maximum(l1, l2))
        lse = m + jnp.log(jnp.exp(l0 - m) + jnp.exp(l1 - m) + jnp.exp(l2 - m))
        return lse - l0                                          # (tm, 1)

    loss_rows = (info_nce_rows(t_p[0], s_p[1], t_p[2], s_p[3]) +
                 info_nce_rows(t_p[1], s_p[0], t_p[3], s_p[2]))  # (tm, 1)
    partial_loss = jnp.sum(loss_rows, axis=0, keepdims=True)     # (1, 1)
    loss_ref[...] += jnp.broadcast_to(partial_loss, loss_ref.shape)

    # Center update: accumulate column sums of the raw teacher outputs.
    # Sum crops first (cheap VPU adds), then one sublane reduce (XLU).
    t_all = (t_raw[0] + t_raw[1]) + (t_raw[2] + t_raw[3])        # (tm, D)
    center_ref[...] += jnp.sum(t_all, axis=0, keepdims=True)     # (1, D)

    @pl.when(i == pl.num_programs(0) - 1)
    def _finalize():
        # (loss1.mean() + loss2.mean()) / 2  ==  accumulated_sum * 0.5 / B
        loss_ref[...] = loss_ref[...] * loss_scale
        # TODO(synk): dist.all_reduce of the batch center across devices
        # (single-device here; multi-chip would use make_async_remote_copy).
        batch_center = center_ref[...] * inv_center_count
        center_ref[...] = c * momentum + batch_center * one_minus_momentum


def dino_loss_contrastive(student_output, teacher_output, center, *,
                          student_temp, teacher_temp, nce_temp=0.1,
                          center_momentum=0.9, world_size=1, block_rows=None):
    total_rows, out_dim = student_output.shape
    assert teacher_output.shape == (total_rows, out_dim)
    assert total_rows % 4 == 0, "module chunks the batch into 4 crops"
    b = total_rows // 4
    if center.ndim == 1:
        center = center.reshape(1, out_dim)

    # Crops as a leading axis so each grid step sees matching rows of all 4 crops.
    s3 = student_output.reshape(4, b, out_dim)
    t3 = teacher_output.reshape(4, b, out_dim)

    # Row tile: multiple of 8 sublanes (or the whole per-crop batch if small).
    if block_rows is None:
        block_rows = min(b, 512)
    if b % block_rows != 0 or (block_rows % 8 != 0 and block_rows != b):
        block_rows = b
    grid = (b // block_rows,)

    # Precomputed multiplicative scalars -> SMEM (no in-kernel divides,
    # no recompilation when the epoch / teacher temperature changes).
    params = jnp.array(
        [1.0 / student_temp,
         1.0 / teacher_temp,
         1.0 / nce_temp,
         center_momentum,
         1.0 - center_momentum,
         0.5 / b,
         1.0 / (total_rows * world_size)],
        dtype=jnp.float32)

    # Rough cost hint for the XLA scheduler (elementwise / reduction bound).
    flops = 24 * total_rows * out_dim
    transcendentals = 2 * total_rows * out_dim
    bytes_accessed = 4 * (2 * total_rows * out_dim + 3 * out_dim + 128)

    loss_slab, new_center = pl.pallas_call(
        dino_loss_kernel,
        out_shape=(jax.ShapeDtypeStruct((1, 128), jnp.float32),
                   jax.ShapeDtypeStruct((1, out_dim), jnp.float32)),
        grid_spec=pltpu.PrefetchScalarGridSpec(
            num_scalar_prefetch=0,
            grid=grid,
            in_specs=(
                pl.BlockSpec(memory_space=pltpu.MemorySpace.SMEM),            # params
                pl.BlockSpec((4, block_rows, out_dim), lambda i: (0, i, 0)),  # student
                pl.BlockSpec((4, block_rows, out_dim), lambda i: (0, i, 0)),  # teacher
                pl.BlockSpec((1, out_dim), lambda i: (0, 0)),                 # center (resident)
            ),
            out_specs=(
                pl.BlockSpec((1, 128), lambda i: (0, 0)),        # loss accumulator
                pl.BlockSpec((1, out_dim), lambda i: (0, 0)),    # new center
            ),
        ),
        # Outputs accumulate across the (only) grid axis -> must be "arbitrary".
        compiler_params=pltpu.CompilerParams(dimension_semantics=("arbitrary",)),
        cost_estimate=pl.CostEstimate(flops=flops,
                                      transcendentals=transcendentals,
                                      bytes_accessed=bytes_accessed),
    )(params, s3, t3, center.astype(jnp.float32))

    return loss_slab[0, 0], new_center


if __name__ == "__main__":
    # Small shapes consistent with the module: (4 crops * 16 rows, out_dim=128).
    out_dim = 128
    rows_per_crop = 16
    total_rows = 4 * rows_per_crop

    student_temp = 0.1
    center_momentum = 0.9
    nce_temp = 0.1
    warmup_teacher_temp, teacher_temp = 0.04, 0.07
    warmup_teacher_temp_epochs, nepochs = 5, 20
    epoch = 3
    teacher_temp_schedule = np.concatenate((
        np.linspace(warmup_teacher_temp, teacher_temp, warmup_teacher_temp_epochs),
        np.ones(nepochs - warmup_teacher_temp_epochs) * teacher_temp))
    temp = float(teacher_temp_schedule[epoch])   # host-side lookup, as in PyTorch

    key = jax.random.PRNGKey(0)
    ks, kt, kc = jax.random.split(key, 3)
    student_output = jax.random.normal(ks, (total_rows, out_dim), jnp.float32)
    teacher_output = jax.random.normal(kt, (total_rows, out_dim), jnp.float32)
    center = 0.1 * jax.random.normal(kc, (1, out_dim), jnp.float32)

    loss, new_center = dino_loss_contrastive(
        student_output, teacher_output, center,
        student_temp=student_temp, teacher_temp=temp, nce_temp=nce_temp,
        center_momentum=center_momentum, block_rows=8)  # 2 grid steps: exercises accumulation
    loss = jax.block_until_ready(loss)
    new_center = jax.block_until_ready(new_center)

    # Pure-JAX reference mirroring the PyTorch module (single device).
    def reference(student, teacher, ctr):
        s_soft = jax.nn.softmax(student / student_temp, axis=-1)
        t_soft = jax.nn.softmax((teacher - ctr) / temp, axis=-1)
        b = student.shape[0] // 4
        s_c = [s_soft[i * b:(i + 1) * b] for i in range(4)]
        t_c = [t_soft[i * b:(i + 1) * b] for i in range(4)]

        def l2(x):
            return x / jnp.sqrt(jnp.sum(x * x, axis=-1, keepdims=True))

        def info_nce(q, p, n1, n2):
            q, p, n1, n2 = map(l2, (q, p, n1, n2))
            logits = jnp.stack([jnp.sum(q * p, -1), jnp.sum(q * n1, -1),
                                jnp.sum(q * n2, -1)], axis=1) / nce_temp
            return jnp.mean(jax.nn.logsumexp(logits, axis=1) - logits[:, 0])

        loss1 = info_nce(t_c[0], s_c[1], t_c[2], s_c[3])
        loss2 = info_nce(t_c[1], s_c[0], t_c[3], s_c[2])
        batch_center = jnp.sum(teacher, axis=0, keepdims=True) / teacher.shape[0]
        new_c = ctr * center_momentum + batch_center * (1.0 - center_momentum)
        return (loss1 + loss2) / 2.0, new_c

    ref_loss, ref_center = reference(student_output, teacher_output, center)
    assert jnp.allclose(loss, ref_loss, atol=1e-4, rtol=1e-4), (loss, ref_loss)
    assert jnp.allclose(new_center, ref_center, atol=1e-5, rtol=1e-5)

    print("KERNEL_OK")
</pallas_src>

<mosaic_0001>
module attributes {stable_mosaic.version = 11 : i64} {
  func.func @dino_loss_kernel(%arg0: i32, %arg1: memref<7xf32, #tpu.memory_space<smem>>, %arg2: memref<4x8x128xf32, #tpu.memory_space<vmem>>, %arg3: memref<4x8x128xf32, #tpu.memory_space<vmem>>, %arg4: memref<1x128xf32, #tpu.memory_space<vmem>>, %arg5: memref<1x128xf32, #tpu.memory_space<vmem>>, %arg6: memref<1x128xf32, #tpu.memory_space<vmem>>) attributes {dimension_semantics = [#tpu.dimension_semantics<arbitrary>], iteration_bounds = array<i64: 2>, scalar_prefetch = 0 : i64, scratch_operands = 0 : i64, tpu.core_type = #tpu.core_type<tc>, window_params = [{transform_indices = @transform_0, window_bounds = array<i64: 7>}, {transform_indices = @transform_1, window_bounds = array<i64: 4, 8, 128>}, {transform_indices = @transform_2, window_bounds = array<i64: 4, 8, 128>}, {pipeline_mode = #tpu.pipeline_mode<synchronous>, transform_indices = @transform_3, window_bounds = array<i64: 1, 128>}, {pipeline_mode = #tpu.pipeline_mode<synchronous>, transform_indices = @transform_4, window_bounds = array<i64: 1, 128>}, {pipeline_mode = #tpu.pipeline_mode<synchronous>, transform_indices = @transform_5, window_bounds = array<i64: 1, 128>}]} {
    %c0 = arith.constant 0 : index
    %0 = memref.load %arg1[%c0] : memref<7xf32, #tpu.memory_space<smem>>
    %c1 = arith.constant 1 : index
    %1 = memref.load %arg1[%c1] : memref<7xf32, #tpu.memory_space<smem>>
    %c2 = arith.constant 2 : index
    %2 = memref.load %arg1[%c2] : memref<7xf32, #tpu.memory_space<smem>>
    %c3 = arith.constant 3 : index
    %3 = memref.load %arg1[%c3] : memref<7xf32, #tpu.memory_space<smem>>
    %c4 = arith.constant 4 : index
    %4 = memref.load %arg1[%c4] : memref<7xf32, #tpu.memory_space<smem>>
    %c5 = arith.constant 5 : index
    %5 = memref.load %arg1[%c5] : memref<7xf32, #tpu.memory_space<smem>>
    %c6 = arith.constant 6 : index
    %6 = memref.load %arg1[%c6] : memref<7xf32, #tpu.memory_space<smem>>
    %c0_i32 = arith.constant 0 : i32
    %7 = arith.cmpi eq, %arg0, %c0_i32 : i32
    %8 = arith.extui %7 : i1 to i32
    %c0_i32_0 = arith.constant 0 : i32
    %9 = arith.cmpi ne, %8, %c0_i32_0 : i32
    scf.if %9 {
      %cst_59 = arith.constant 0.000000e+00 : f32
      %214 = vector.broadcast %cst_59 : f32 to vector<1x128xf32>
      %c0_60 = arith.constant 0 : index
      %c0_61 = arith.constant 0 : index
      %215 = vector.load %arg5[%c0_60, %c0_61] : memref<1x128xf32, #tpu.memory_space<vmem>>, vector<1x128xf32>
      tpu.vector_store %arg5[%c0_60, %c0_61], %214 {strides = array<i32>} : memref<1x128xf32, #tpu.memory_space<vmem>>, vector<1x128xf32>,
      %cst_62 = arith.constant 0.000000e+00 : f32
      %216 = vector.broadcast %cst_62 : f32 to vector<1x128xf32>
      %c0_63 = arith.constant 0 : index
      %c0_64 = arith.constant 0 : index
      %217 = vector.load %arg6[%c0_63, %c0_64] : memref<1x128xf32, #tpu.memory_space<vmem>>, vector<1x128xf32>
      tpu.vector_store %arg6[%c0_63, %c0_64], %216 {strides = array<i32>} : memref<1x128xf32, #tpu.memory_space<vmem>>, vector<1x128xf32>,
    } else {
    }
    %c0_1 = arith.constant 0 : index
    %c0_2 = arith.constant 0 : index
    %10 = vector.load %arg4[%c0_1, %c0_2] : memref<1x128xf32, #tpu.memory_space<vmem>>, vector<1x128xf32>
    %c0_3 = arith.constant 0 : index
    %c0_4 = arith.constant 0 : index
    %c0_5 = arith.constant 0 : index
    %11 = vector.load %arg2[%c0_3, %c0_4, %c0_5] : memref<4x8x128xf32, #tpu.memory_space<vmem>>, vector<1x8x128xf32>
    %12 = vector.shape_cast %11 : vector<1x8x128xf32> to vector<8x128xf32>
    %c1_6 = arith.constant 1 : index
    %c0_7 = arith.constant 0 : index
    %c0_8 = arith.constant 0 : index
    %13 = vector.load %arg2[%c1_6, %c0_7, %c0_8] : memref<4x8x128xf32, #tpu.memory_space<vmem>>, vector<1x8x128xf32>
    %14 = vector.shape_cast %13 : vector<1x8x128xf32> to vector<8x128xf32>
    %c2_9 = arith.constant 2 : index
    %c0_10 = arith.constant 0 : index
    %c0_11 = arith.constant 0 : index
    %15 = vector.load %arg2[%c2_9, %c0_10, %c0_11] : memref<4x8x128xf32, #tpu.memory_space<vmem>>, vector<1x8x128xf32>
    %16 = vector.shape_cast %15 : vector<1x8x128xf32> to vector<8x128xf32>
    %c3_12 = arith.constant 3 : index
    %c0_13 = arith.constant 0 : index
    %c0_14 = arith.constant 0 : index
    %17 = vector.load %arg2[%c3_12, %c0_13, %c0_14] : memref<4x8x128xf32, #tpu.memory_space<vmem>>, vector<1x8x128xf32>
    %18 = vector.shape_cast %17 : vector<1x8x128xf32> to vector<8x128xf32>
    %c0_15 = arith.constant 0 : index
    %c0_16 = arith.constant 0 : index
    %c0_17 = arith.constant 0 : index
    %19 = vector.load %arg3[%c0_15, %c0_16, %c0_17] : memref<4x8x128xf32, #tpu.memory_space<vmem>>, vector<1x8x128xf32>
    %20 = vector.shape_cast %19 : vector<1x8x128xf32> to vector<8x128xf32>
    %c1_18 = arith.constant 1 : index
    %c0_19 = arith.constant 0 : index
    %c0_20 = arith.constant 0 : index
    %21 = vector.load %arg3[%c1_18, %c0_19, %c0_20] : memref<4x8x128xf32, #tpu.memory_space<vmem>>, vector<1x8x128xf32>
    %22 = vector.shape_cast %21 : vector<1x8x128xf32> to vector<8x128xf32>
    %c2_21 = arith.constant 2 : index
    %c0_22 = arith.constant 0 : index
    %c0_23 = arith.constant 0 : index
    %23 = vector.load %arg3[%c2_21, %c0_22, %c0_23] : memref<4x8x128xf32, #tpu.memory_space<vmem>>, vector<1x8x128xf32>
    %24 = vector.shape_cast %23 : vector<1x8x128xf32> to vector<8x128xf32>
    %c3_24 = arith.constant 3 : index
    %c0_25 = arith.constant 0 : index
    %c0_26 = arith.constant 0 : index
    %25 = vector.load %arg3[%c3_24, %c0_25, %c0_26] : memref<4x8x128xf32, #tpu.memory_space<vmem>>, vector<1x8x128xf32>
    %26 = vector.shape_cast %25 : vector<1x8x128xf32> to vector<8x128xf32>
    %27 = vector.broadcast %0 : f32 to vector<8x128xf32>
    %28 = arith.mulf %12, %27 : vector<8x128xf32>
    %cst = arith.constant dense<0xFF800000> : vector<8xf32>
    %29 = vector.multi_reduction <maximumf>, %28, %cst [1] : vector<8x128xf32> to vector<8xf32>
    %30 = vector.shape_cast %29 : vector<8xf32> to vector<8x1xf32>
    %31 = vector.broadcast %30 : vector<8x1xf32> to vector<8x128xf32>
    %32 = arith.subf %28, %31 : vector<8x128xf32>
    %33 = math.exp %32 : vector<8x128xf32>
    %34 = arith.mulf %33, %33 : vector<8x128xf32>
    %cst_27 = arith.constant dense<0.000000e+00> : vector<8xf32>
    %35 = vector.multi_reduction <add>, %34, %cst_27 [1] : vector<8x128xf32> to vector<8xf32>
    %36 = vector.shape_cast %35 : vector<8xf32> to vector<8x1xf32>
    %37 = math.rsqrt %36 : vector<8x1xf32>
    %38 = vector.broadcast %37 : vector<8x1xf32> to vector<8x128xf32>
    %39 = arith.mulf %33, %38 : vector<8x128xf32>
    %40 = vector.broadcast %0 : f32 to vector<8x128xf32>
    %41 = arith.mulf %14, %40 : vector<8x128xf32>
    %cst_28 = arith.constant dense<0xFF800000> : vector<8xf32>
    %42 = vector.multi_reduction <maximumf>, %41, %cst_28 [1] : vector<8x128xf32> to vector<8xf32>
    %43 = vector.shape_cast %42 : vector<8xf32> to vector<8x1xf32>
    %44 = vector.broadcast %43 : vector<8x1xf32> to vector<8x128xf32>
    %45 = arith.subf %41, %44 : vector<8x128xf32>
    %46 = math.exp %45 : vector<8x128xf32>
    %47 = arith.mulf %46, %46 : vector<8x128xf32>
    %cst_29 = arith.constant dense<0.000000e+00> : vector<8xf32>
    %48 = vector.multi_reduction <add>, %47, %cst_29 [1] : vector<8x128xf32> to vector<8xf32>
    %49 = vector.shape_cast %48 : vector<8xf32> to vector<8x1xf32>
    %50 = math.rsqrt %49 : vector<8x1xf32>
    %51 = vector.broadcast %50 : vector<8x1xf32> to vector<8x128xf32>
    %52 = arith.mulf %46, %51 : vector<8x128xf32>
    %53 = vector.broadcast %0 : f32 to vector<8x128xf32>
    %54 = arith.mulf %16, %53 : vector<8x128xf32>
    %cst_30 = arith.constant dense<0xFF800000> : vector<8xf32>
    %55 = vector.multi_reduction <maximumf>, %54, %cst_30 [1] : vector<8x128xf32> to vector<8xf32>
    %56 = vector.shape_cast %55 : vector<8xf32> to vector<8x1xf32>
    %57 = vector.broadcast %56 : vector<8x1xf32> to vector<8x128xf32>
    %58 = arith.subf %54, %57 : vector<8x128xf32>
    %59 = math.exp %58 : vector<8x128xf32>
    %60 = arith.mulf %59, %59 : vector<8x128xf32>
    %cst_31 = arith.constant dense<0.000000e+00> : vector<8xf32>
    %61 = vector.multi_reduction <add>, %60, %cst_31 [1] : vector<8x128xf32> to vector<8xf32>
    %62 = vector.shape_cast %61 : vector<8xf32> to vector<8x1xf32>
    %63 = math.rsqrt %62 : vector<8x1xf32>
    %64 = vector.broadcast %63 : vector<8x1xf32> to vector<8x128xf32>
    %65 = arith.mulf %59, %64 : vector<8x128xf32>
    %66 = vector.broadcast %0 : f32 to vector<8x128xf32>
    %67 = arith.mulf %18, %66 : vector<8x128xf32>
    %cst_32 = arith.constant dense<0xFF800000> : vector<8xf32>
    %68 = vector.multi_reduction <maximumf>, %67, %cst_32 [1] : vector<8x128xf32> to vector<8xf32>
    %69 = vector.shape_cast %68 : vector<8xf32> to vector<8x1xf32>
    %70 = vector.broadcast %69 : vector<8x1xf32> to vector<8x128xf32>
    %71 = arith.subf %67, %70 : vector<8x128xf32>
    %72 = math.exp %71 : vector<8x128xf32>
    %73 = arith.mulf %72, %72 : vector<8x128xf32>
    %cst_33 = arith.constant dense<0.000000e+00> : vector<8xf32>
    %74 = vector.multi_reduction <add>, %73, %cst_33 [1] : vector<8x128xf32> to vector<8xf32>
    %75 = vector.shape_cast %74 : vector<8xf32> to vector<8x1xf32>
    %76 = math.rsqrt %75 : vector<8x1xf32>
    %77 = vector.broadcast %76 : vector<8x1xf32> to vector<8x128xf32>
    %78 = arith.mulf %72, %77 : vector<8x128xf32>
    %79 = vector.broadcast %10 : vector<1x128xf32> to vector<8x128xf32>
    %80 = arith.subf %20, %79 : vector<8x128xf32>
    %81 = vector.broadcast %1 : f32 to vector<8x128xf32>
    %82 = arith.mulf %80, %81 : vector<8x128xf32>
    %cst_34 = arith.constant dense<0xFF800000> : vector<8xf32>
    %83 = vector.multi_reduction <maximumf>, %82, %cst_34 [1] : vector<8x128xf32> to vector<8xf32>
    %84 = vector.shape_cast %83 : vector<8xf32> to vector<8x1xf32>
    %85 = vector.broadcast %84 : vector<8x1xf32> to vector<8x128xf32>
    %86 = arith.subf %82, %85 : vector<8x128xf32>
    %87 = math.exp %86 : vector<8x128xf32>
    %88 = arith.mulf %87, %87 : vector<8x128xf32>
    %cst_35 = arith.constant dense<0.000000e+00> : vector<8xf32>
    %89 = vector.multi_reduction <add>, %88, %cst_35 [1] : vector<8x128xf32> to vector<8xf32>
    %90 = vector.shape_cast %89 : vector<8xf32> to vector<8x1xf32>
    %91 = math.rsqrt %90 : vector<8x1xf32>
    %92 = vector.broadcast %91 : vector<8x1xf32> to vector<8x128xf32>
    %93 = arith.mulf %87, %92 : vector<8x128xf32>
    %94 = vector.broadcast %10 : vector<1x128xf32> to vector<8x128xf32>
    %95 = arith.subf %22, %94 : vector<8x128xf32>
    %96 = vector.broadcast %1 : f32 to vector<8x128xf32>
    %97 = arith.mulf %95, %96 : vector<8x128xf32>
    %cst_36 = arith.constant dense<0xFF800000> : vector<8xf32>
    %98 = vector.multi_reduction <maximumf>, %97, %cst_36 [1] : vector<8x128xf32> to vector<8xf32>
    %99 = vector.shape_cast %98 : vector<8xf32> to vector<8x1xf32>
    %100 = vector.broadcast %99 : vector<8x1xf32> to vector<8x128xf32>
    %101 = arith.subf %97, %100 : vector<8x128xf32>
    %102 = math.exp %101 : vector<8x128xf32>
    %103 = arith.mulf %102, %102 : vector<8x128xf32>
    %cst_37 = arith.constant dense<0.000000e+00> : vector<8xf32>
    %104 = vector.multi_reduction <add>, %103, %cst_37 [1] : vector<8x128xf32> to vector<8xf32>
    %105 = vector.shape_cast %104 : vector<8xf32> to vector<8x1xf32>
    %106 = math.rsqrt %105 : vector<8x1xf32>
    %107 = vector.broadcast %106 : vector<8x1xf32> to vector<8x128xf32>
    %108 = arith.mulf %102, %107 : vector<8x128xf32>
    %109 = vector.broadcast %10 : vector<1x128xf32> to vector<8x128xf32>
    %110 = arith.subf %24, %109 : vector<8x128xf32>
    %111 = vector.broadcast %1 : f32 to vector<8x128xf32>
    %112 = arith.mulf %110, %111 : vector<8x128xf32>
    %cst_38 = arith.constant dense<0xFF800000> : vector<8xf32>
    %113 = vector.multi_reduction <maximumf>, %112, %cst_38 [1] : vector<8x128xf32> to vector<8xf32>
    %114 = vector.shape_cast %113 : vector<8xf32> to vector<8x1xf32>
    %115 = vector.broadcast %114 : vector<8x1xf32> to vector<8x128xf32>
    %116 = arith.subf %112, %115 : vector<8x128xf32>
    %117 = math.exp %116 : vector<8x128xf32>
    %118 = arith.mulf %117, %117 : vector<8x128xf32>
    %cst_39 = arith.constant dense<0.000000e+00> : vector<8xf32>
    %119 = vector.multi_reduction <add>, %118, %cst_39 [1] : vector<8x128xf32> to vector<8xf32>
    %120 = vector.shape_cast %119 : vector<8xf32> to vector<8x1xf32>
    %121 = math.rsqrt %120 : vector<8x1xf32>
    %122 = vector.broadcast %121 : vector<8x1xf32> to vector<8x128xf32>
    %123 = arith.mulf %117, %122 : vector<8x128xf32>
    %124 = vector.broadcast %10 : vector<1x128xf32> to vector<8x128xf32>
    %125 = arith.subf %26, %124 : vector<8x128xf32>
    %126 = vector.broadcast %1 : f32 to vector<8x128xf32>
    %127 = arith.mulf %125, %126 : vector<8x128xf32>
    %cst_40 = arith.constant dense<0xFF800000> : vector<8xf32>
    %128 = vector.multi_reduction <maximumf>, %127, %cst_40 [1] : vector<8x128xf32> to vector<8xf32>
    %129 = vector.shape_cast %128 : vector<8xf32> to vector<8x1xf32>
    %130 = vector.broadcast %129 : vector<8x1xf32> to vector<8x128xf32>
    %131 = arith.subf %127, %130 : vector<8x128xf32>
    %132 = math.exp %131 : vector<8x128xf32>
    %133 = arith.mulf %132, %132 : vector<8x128xf32>
    %cst_41 = arith.constant dense<0.000000e+00> : vector<8xf32>
    %134 = vector.multi_reduction <add>, %133, %cst_41 [1] : vector<8x128xf32> to vector<8xf32>
    %135 = vector.shape_cast %134 : vector<8xf32> to vector<8x1xf32>
    %136 = math.rsqrt %135 : vector<8x1xf32>
    %137 = vector.broadcast %136 : vector<8x1xf32> to vector<8x128xf32>
    %138 = arith.mulf %132, %137 : vector<8x128xf32>
    %139 = arith.mulf %93, %52 : vector<8x128xf32>
    %cst_42 = arith.constant dense<0.000000e+00> : vector<8xf32>
    %140 = vector.multi_reduction <add>, %139, %cst_42 [1] : vector<8x128xf32> to vector<8xf32>
    %141 = vector.shape_cast %140 : vector<8xf32> to vector<8x1xf32>
    %142 = vector.broadcast %2 : f32 to vector<8x1xf32>
    %143 = arith.mulf %141, %142 : vector<8x1xf32>
    %144 = arith.mulf %93, %123 : vector<8x128xf32>
    %cst_43 = arith.constant dense<0.000000e+00> : vector<8xf32>
    %145 = vector.multi_reduction <add>, %144, %cst_43 [1] : vector<8x128xf32> to vector<8xf32>
    %146 = vector.shape_cast %145 : vector<8xf32> to vector<8x1xf32>
    %147 = vector.broadcast %2 : f32 to vector<8x1xf32>
    %148 = arith.mulf %146, %147 : vector<8x1xf32>
    %149 = arith.mulf %93, %78 : vector<8x128xf32>
    %cst_44 = arith.constant dense<0.000000e+00> : vector<8xf32>
    %150 = vector.multi_reduction <add>, %149, %cst_44 [1] : vector<8x128xf32> to vector<8xf32>
    %151 = vector.shape_cast %150 : vector<8xf32> to vector<8x1xf32>
    %152 = vector.broadcast %2 : f32 to vector<8x1xf32>
    %153 = arith.mulf %151, %152 : vector<8x1xf32>
    %154 = arith.maximumf %148, %153 : vector<8x1xf32>
    %155 = arith.maximumf %143, %154 : vector<8x1xf32>
    %156 = arith.subf %143, %155 : vector<8x1xf32>
    %157 = math.exp %156 : vector<8x1xf32>
    %158 = arith.subf %148, %155 : vector<8x1xf32>
    %159 = math.exp %158 : vector<8x1xf32>
    %160 = arith.addf %157, %159 : vector<8x1xf32>
    %161 = arith.subf %153, %155 : vector<8x1xf32>
    %162 = math.exp %161 : vector<8x1xf32>
    %163 = arith.addf %160, %162 : vector<8x1xf32>
    %164 = math.log %163 : vector<8x1xf32>
    %165 = arith.addf %155, %164 : vector<8x1xf32>
    %166 = arith.subf %165, %143 : vector<8x1xf32>
    %167 = arith.mulf %108, %39 : vector<8x128xf32>
    %cst_45 = arith.constant dense<0.000000e+00> : vector<8xf32>
    %168 = vector.multi_reduction <add>, %167, %cst_45 [1] : vector<8x128xf32> to vector<8xf32>
    %169 = vector.shape_cast %168 : vector<8xf32> to vector<8x1xf32>
    %170 = vector.broadcast %2 : f32 to vector<8x1xf32>
    %171 = arith.mulf %169, %170 : vector<8x1xf32>
    %172 = arith.mulf %108, %138 : vector<8x128xf32>
    %cst_46 = arith.constant dense<0.000000e+00> : vector<8xf32>
    %173 = vector.multi_reduction <add>, %172, %cst_46 [1] : vector<8x128xf32> to vector<8xf32>
    %174 = vector.shape_cast %173 : vector<8xf32> to vector<8x1xf32>
    %175 = vector.broadcast %2 : f32 to vector<8x1xf32>
    %176 = arith.mulf %174, %175 : vector<8x1xf32>
    %177 = arith.mulf %108, %65 : vector<8x128xf32>
    %cst_47 = arith.constant dense<0.000000e+00> : vector<8xf32>
    %178 = vector.multi_reduction <add>, %177, %cst_47 [1] : vector<8x128xf32> to vector<8xf32>
    %179 = vector.shape_cast %178 : vector<8xf32> to vector<8x1xf32>
    %180 = vector.broadcast %2 : f32 to vector<8x1xf32>
    %181 = arith.mulf %179, %180 : vector<8x1xf32>
    %182 = arith.maximumf %176, %181 : vector<8x1xf32>
    %183 = arith.maximumf %171, %182 : vector<8x1xf32>
    %184 = arith.subf %171, %183 : vector<8x1xf32>
    %185 = math.exp %184 : vector<8x1xf32>
    %186 = arith.subf %176, %183 : vector<8x1xf32>
    %187 = math.exp %186 : vector<8x1xf32>
    %188 = arith.addf %185, %187 : vector<8x1xf32>
    %189 = arith.subf %181, %183 : vector<8x1xf32>
    %190 = math.exp %189 : vector<8x1xf32>
    %191 = arith.addf %188, %190 : vector<8x1xf32>
    %192 = math.log %191 : vector<8x1xf32>
    %193 = arith.addf %183, %192 : vector<8x1xf32>
    %194 = arith.subf %193, %171 : vector<8x1xf32>
    %195 = arith.addf %166, %194 : vector<8x1xf32>
    %cst_48 = arith.constant dense<0.000000e+00> : vector<1xf32>
    %196 = vector.multi_reduction <add>, %195, %cst_48 [0] : vector<8x1xf32> to vector<1xf32>
    %197 = vector.shape_cast %196 : vector<1xf32> to vector<1x1xf32>
    %c0_49 = arith.constant 0 : index
    %c0_50 = arith.constant 0 : index
    %198 = vector.load %arg5[%c0_49, %c0_50] : memref<1x128xf32, #tpu.memory_space<vmem>>, vector<1x128xf32>
    %199 = vector.shape_cast %197 : vector<1x1xf32> to vector<1x1xf32>
    %200 = vector.broadcast %199 : vector<1x1xf32> to vector<1x128xf32>
    %201 = arith.addf %198, %200 : vector<1x128xf32>
    %c0_51 = arith.constant 0 : index
    %c0_52 = arith.constant 0 : index
    %202 = vector.load %arg5[%c0_51, %c0_52] : memref<1x128xf32, #tpu.memory_space<vmem>>, vector<1x128xf32>
    tpu.vector_store %arg5[%c0_51, %c0_52], %201 {strides = array<i32>} : memref<1x128xf32, #tpu.memory_space<vmem>>, vector<1x128xf32>,
    %203 = arith.addf %20, %22 : vector<8x128xf32>
    %204 = arith.addf %24, %26 : vector<8x128xf32>
    %205 = arith.addf %203, %204 : vector<8x128xf32>
    %c0_53 = arith.constant 0 : index
    %c0_54 = arith.constant 0 : index
    %206 = vector.load %arg6[%c0_53, %c0_54] : memref<1x128xf32, #tpu.memory_space<vmem>>, vector<1x128xf32>
    %cst_55 = arith.constant dense<0.000000e+00> : vector<128xf32>
    %207 = vector.multi_reduction <add>, %205, %cst_55 [0] : vector<8x128xf32> to vector<128xf32>
    %208 = vector.shape_cast %207 : vector<128xf32> to vector<1x128xf32>
    %209 = arith.addf %206, %208 : vector<1x128xf32>
    %c0_56 = arith.constant 0 : index
    %c0_57 = arith.constant 0 : index
    %210 = vector.load %arg6[%c0_56, %c0_57] : memref<1x128xf32, #tpu.memory_space<vmem>>, vector<1x128xf32>
    tpu.vector_store %arg6[%c0_56, %c0_57], %209 {strides = array<i32>} : memref<1x128xf32, #tpu.memory_space<vmem>>, vector<1x128xf32>,
    %c1_i32 = arith.constant 1 : i32
    %211 = arith.cmpi eq, %arg0, %c1_i32 : i32
    %212 = arith.extui %211 : i1 to i32
    %c0_i32_58 = arith.constant 0 : i32
    %213 = arith.cmpi ne, %212, %c0_i32_58 : i32
    scf.if %213 {
      %c0_59 = arith.constant 0 : index
      %c0_60 = arith.constant 0 : index
      %214 = vector.load %arg5[%c0_59, %c0_60] : memref<1x128xf32, #tpu.memory_space<vmem>>, vector<1x128xf32>
      %215 = vector.broadcast %5 : f32 to vector<1x128xf32>
      %216 = arith.mulf %214, %215 : vector<1x128xf32>
      %c0_61 = arith.constant 0 : index
      %c0_62 = arith.constant 0 : index
      %217 = vector.load %arg5[%c0_61, %c0_62] : memref<1x128xf32, #tpu.memory_space<vmem>>, vector<1x128xf32>
      tpu.vector_store %arg5[%c0_61, %c0_62], %216 {strides = array<i32>} : memref<1x128xf32, #tpu.memory_space<vmem>>, vector<1x128xf32>,
      %c0_63 = arith.constant 0 : index
      %c0_64 = arith.constant 0 : index
      %218 = vector.load %arg6[%c0_63, %c0_64] : memref<1x128xf32, #tpu.memory_space<vmem>>, vector<1x128xf32>
      %219 = vector.broadcast %6 : f32 to vector<1x128xf32>
      %220 = arith.mulf %218, %219 : vector<1x128xf32>
      %221 = vector.broadcast %3 : f32 to vector<1x128xf32>
      %222 = arith.mulf %10, %221 : vector<1x128xf32>
      %223 = vector.broadcast %4 : f32 to vector<1x128xf32>
      %224 = arith.mulf %220, %223 : vector<1x128xf32>
      %225 = arith.addf %222, %224 : vector<1x128xf32>
      %c0_65 = arith.constant 0 : index
      %c0_66 = arith.constant 0 : index
      %226 = vector.load %arg6[%c0_65, %c0_66] : memref<1x128xf32, #tpu.memory_space<vmem>>, vector<1x128xf32>
      tpu.vector_store %arg6[%c0_65, %c0_66], %225 {strides = array<i32>} : memref<1x128xf32, #tpu.memory_space<vmem>>, vector<1x128xf32>,
    } else {
    }
    return
  }
  func.func @transform_0(%arg0: i32) -> i32 {
    %c0_i32 = arith.constant 0 : i32
    %c0_i32_0 = arith.constant 0 : i32
    return %c0_i32 : i32
  }
  func.func @transform_1(%arg0: i32) -> (i32, i32, i32) {
    %c0_i32 = arith.constant 0 : i32
    %c0_i32_0 = arith.constant 0 : i32
    %c0_i32_1 = arith.constant 0 : i32
    return %c0_i32, %arg0, %c0_i32_0 : i32, i32, i32
  }
  func.func @transform_2(%arg0: i32) -> (i32, i32, i32) {
    %c0_i32 = arith.constant 0 : i32
    %c0_i32_0 = arith.constant 0 : i32
    %c0_i32_1 = arith.constant 0 : i32
    return %c0_i32, %arg0, %c0_i32_0 : i32, i32, i32
  }
  func.func @transform_3(%arg0: i32) -> (i32, i32) {
    %c0_i32 = arith.constant 0 : i32
    %c0_i32_0 = arith.constant 0 : i32
    %c0_i32_1 = arith.constant 0 : i32
    return %c0_i32, %c0_i32_0 : i32, i32
  }
  func.func @transform_4(%arg0: i32) -> (i32, i32) {
    %c0_i32 = arith.constant 0 : i32
    %c0_i32_0 = arith.constant 0 : i32
    %c0_i32_1 = arith.constant 0 : i32
    return %c0_i32, %c0_i32_0 : i32, i32
  }
  func.func @transform_5(%arg0: i32) -> (i32, i32) {
    %c0_i32 = arith.constant 0 : i32
    %c0_i32_0 = arith.constant 0 : i32
    %c0_i32_1 = arith.constant 0 : i32
    return %c0_i32, %c0_i32_0 : i32, i32
  }
}

</mosaic_0001>

<bundles_post_ra>
// kernel: tpu_custom_call.1
= control target key start
LH: loop header
LB: loop body
LE: loop exit
PB: predicated region body
PF: predicated region fallthrough
CT: control target
= control target key end

     0   :  { %11 = vsyncpa [#allocation5], 0  ;;  %s1204_s0 = inlined_call_operand.hbm [shape: f32[7], index: 0, kind: input, shape index: {}]   ;;  %s1205_s1 = inlined_call_operand.hbm [shape: f32[4,16,128], index: 1, kind: input, shape index: {}]   ;;  %s1206_s2 = inlined_call_operand.hbm [shape: f32[4,16,128], index: 2, kind: input, shape index: {}]   ;;  %s1207_s3 = inlined_call_operand.vmem [shape: f32[1,128], index: 3, kind: input, shape index: {}]   ;;  %s1208_s4 = inlined_call_operand.hbm [shape: f32[1,128], index: 4, kind: output, shape index: {0}]   ;;  %s1209_s5 = inlined_call_operand.hbm [shape: f32[1,128], index: 5, kind: output, shape index: {1}]  }
   0x1   :  { %12 = vsyncpa [#allocation3], 0 }
   0x2   :  { %14 = vsyncpa [#allocation3 + $0x1], 0 }
   0x3   :  { %15 = vsyncpa [#allocation8], 0 }
   0x4   :  { %17 = vsyncpa [#allocation8 + $0x1], 0 }
   0x5   :  { %18 = vsyncpa [#allocation4], 0 }
   0x6   :  { %19 = vsyncpa [#allocation11], 0  ;;  %s979_s18 = smov 0   ;;  %s981_s19 = smov 0  }
   0x7   :  { %s983_s20 = smov 0   ;;  %s985_s21 = smov 0  }
   0x8 LB: > { %s998_s22 = sadd.s32 4294967295, %s938_s21   ;;  %s1001_s23 = sadd.s32 1, %s938_s21   ;;  %s938_s21 = sphi %s985_s21, %s1222_s21   ;;  %s934_s20 = sphi %s983_s20, %s1221_s20   ;;  %s930_s19 = sphi %s981_s19, %s1220_s19   ;;  %s926_s18 = sphi %s979_s18, %s1219_s18  }
   0x9   : > { %s50_s24 = ssub.s32 %s938_s21, %s1001_s23  ;;  %s53_s25 = sadd.s32 1, %s934_s20 }
   0xa   : > { %p51_p0 = scmp.eq.s32.totalorder %s50_s24, 0  ;;  %p60_p1 = scmp.ne.s32.totalorder %s934_s20, %s930_s19 }
   0xb   : > { %p61_p2 = scmp.eq.s32.totalorder %s938_s21, 0  ;;  %p66_p3 = scmp.ne.s32.totalorder %s930_s19, %s926_s18 }
   0xc   : > { %s1011_s26 = scalar_select %p51_p0, %s934_s20, %s53_s25  }
   0xd   : > { %p62_p4 = por %p61_p2, %p60_p1  ;;  %p1210_p5 = scmp.eq.s32.totalorder %s998_s22, 0 }
   0xe   : > { %p621_p6 = scmp.ge.s32.totalorder %s938_s21, 1  ;;  %p166_p7 = scmp.lt.s32.totalorder %s938_s21, 3 }
   0xf   : > { %p1018_p8 = por %p1210_p5, %p66_p3  ;;  %p680_p11 = scmp.lt.s32.totalorder %s938_s21, 2 }
  0x10   : > { %p1023_p10 = pnand %p621_p6, %p166_p7  ;;  %s1031_s29 = sand.u32 1, %s934_s20  }
  0x11   : > { %s1212_s27 = scalar_select %p1018_p8, 1, 0 }
  0x12   : > { %p668_p12 = pneg %p1023_p10  ;;  %p1033_p13 = pnand %p680_p11, %p62_p4 }
  0x13   : > { %s624_s6 = sshll.u32 %s1031_s29, 5  ;;  %s625_s7 = sshll.u32 %s938_s21, 7 }
  0x14   : > { %p669_p0 = pnand %p668_p12, %p1210_p5  ;;  %s940_s8 = smov [#allocation2]  }
  0x15   : > { %s1049_s13 = scalar_lea.hbm %s1205_s1, %s625_s7  ;;  %s195_s14 = scalar_lea.vmem [#allocation6], %s624_s6 }
  0x16   : > { %671 = dma.hbm_to_smem (!%p669_p0), %s1204_s0, 16, %s940_s8, [#allocation5]  }
  0x17   : > { %s201_s15 = sshll.u32 %s195_s14, 4  ;;  %s192_s16 = scalar_lea.sflag [#allocation3], %s1031_s29  ;;  %s1053_s15 = int_to_ptr.vmem [resolvable:$true] %s201_s15 }
  0x18   : > { %s784_s17 = scalar_lea.hbm %s1049_s13, 512  ;;  %p786_p2 = pneg %p1033_p13 }
  0x19   : > { %p785_p1 = scmp.ne.s32.totalorder %s1049_s13, %s784_s17  ;;  %s789_s25 = scalar_lea.hbm %s1205_s1, 1024 }
  0x1a   : > { %p790_p6 = scmp.lt.s32.totalorder %s1049_s13, %s1205_s1  ;;  %p791_p7 = scmp.lt.s32.totalorder %s789_s25, %s784_s17 }
  0x1b   : > { %p787_p3 = pnand %p786_p2, %p785_p1 }
  0x1c   : > { %p792_p11 = por %p791_p7, %p790_p6 }
  0x1d   : > { %p788_p4 = pneg %p787_p3 }
  0x1f   : > { %p793_p12 = pnand %p792_p11, %p788_p4 }
  0x21   : > { %796 = shalt.err (!%p793_p12)
}
  0x22   : > { %s797_s10 = scalar_lea.vmem %s1053_s15, 512  ;;  %s941_s11 = smov [#allocation6]  }
  0x23   : > { %p798_p0 = scmp.ne.s32.totalorder %s1053_s15, %s797_s10  ;;  %s802_s12 = sshll.u32 %s941_s11, 4  ;;  %s803_s12 = int_to_ptr.vmem [resolvable:$false] %s802_s12 }
  0x24   : > { %s804_s14 = scalar_lea.vmem %s803_s12, 1024  ;;  %p805_p9 = scmp.lt.s32.totalorder %s1053_s15, %s803_s12 }
  0x25   : > { %p800_p1 = pnand %p798_p0, %p786_p2  ;;  %p806_p5 = scmp.lt.s32.totalorder %s804_s14, %s797_s10 }
  0x27   : > { %p801_p3 = pneg %p800_p1  ;;  %p807_p8 = por %p806_p5, %p805_p9 }
  0x29   : > { %p808_p6 = pnand %p807_p8, %p801_p3 }
  0x2b   : > { %811 = shalt.err (!%p808_p6)
}
  0x2c   : > { %s942_s17 = smov 256   ;;  %s943_s18 = smov 128  }
  0x2d   : > { %s944_s24 = smov 8   ;;  %s1090_s9 = scalar_lea.hbm %s1206_s2, %s625_s7 }
  0x2e   : > { %675 = dma.hbm_to_vmem [thread:$0]  (!%p1033_p13), %s1049_s13, 512, %s1053_s15, %s192_s16, %s942_s17, %s943_s18, %s944_s24  }
  0x2f   : > { %s215_s10 = scalar_lea.vmem [#allocation7], %s624_s6  ;;  %s212_s12 = scalar_lea.sflag [#allocation8], %s1031_s29 }
  0x30   : > { %s221_s11 = sshll.u32 %s215_s10, 4  ;;  %s812_s14 = scalar_lea.hbm %s1090_s9, 512  ;;  %s1094_s11 = int_to_ptr.vmem [resolvable:$true] %s221_s11 }
  0x31   : > { %p813_p5 = scmp.ne.s32.totalorder %s1090_s9, %s812_s14  ;;  %s817_s7 = scalar_lea.hbm %s1206_s2, 1024 }
  0x32   : > { %p818_p4 = scmp.lt.s32.totalorder %s1090_s9, %s1206_s2  ;;  %p819_p7 = scmp.lt.s32.totalorder %s817_s7, %s812_s14 }
  0x33   : > { %p815_p8 = pnand %p813_p5, %p786_p2 }
  0x34   : > { %p820_p11 = por %p819_p7, %p818_p4 }
  0x35   : > { %p816_p9 = pneg %p815_p8 }
  0x37   : > { %p821_p12 = pnand %p820_p11, %p816_p9 }
  0x39   : > { %824 = shalt.err (!%p821_p12)
}
  0x3a   : > { %s825_s29 = scalar_lea.vmem %s1094_s11, 512  ;;  %s945_s6 = smov [#allocation7]  }
  0x3b   : > { %p826_p0 = scmp.ne.s32.totalorder %s1094_s11, %s825_s29  ;;  %s830_s25 = sshll.u32 %s945_s6, 4  ;;  %s831_s25 = int_to_ptr.vmem [resolvable:$false] %s830_s25 }
  0x3c   : > { %s832_s8 = scalar_lea.vmem %s831_s25, 1024  ;;  %p833_p6 = scmp.lt.s32.totalorder %s1094_s11, %s831_s25 }
  0x3d   : > { %p828_p1 = pnand %p826_p0, %p786_p2  ;;  %p834_p5 = scmp.lt.s32.totalorder %s832_s8, %s825_s29 }
  0x3f   : > { %p829_p3 = pneg %p828_p1  ;;  %p835_p8 = por %p834_p5, %p833_p6 }
  0x41   : > { %p836_p4 = pnand %p835_p8, %p829_p3 }
  0x43   : > { %839 = shalt.err (!%p836_p4)
}
  0x44   : > { %678 = dma.hbm_to_vmem [thread:$0]  (!%p1033_p13), %s1090_s9, 512, %s1094_s11, %s212_s12, %s942_s17, %s943_s18, %s944_s24  }
  0x45   : > { %233 = sbr.rel (%p1023_p10) target bundleno = 672 (0x2a0), region = 36  ;;  %p1215_p2 = scmp.eq.s32.totalorder (!%p1023_p10), %s998_s22, 0 }
  0x4a   : > { %905 = dma.done.wait (%p1215_p2), [#allocation5], 16   ;;  %p1216_p9 = pmov %p1215_p2 }
  0x4b   : > { %s239_s10 = sand.u32 1, %s930_s19   ;;  %p1217_p7 = scmp.ne.s32.totalorder %s1212_s27, 0 }
  0x4c   : > { %907 = vsyncadd (%p1216_p9), [#allocation5], 4294967280  ;;  %s630_s14 = sshll.u32 %s239_s10, 5  ;;  %s240_s30 = scalar_lea.sflag [#allocation3], %s239_s10 }
  0x4d   : > { %s1129_s21 = scalar_lea.vmem [#allocation6], %s630_s14 }
  0x4e   : > { %909 = dma.done.wait (%p1217_p7), %s240_s30, 512  }
  0x4f   : > { %911 = vsyncadd (%p1217_p7), %s240_s30, 4294966784  ;;  %s249_s28 = scalar_lea.sflag [#allocation8], %s239_s10  ;;  %s252_s17 = scalar_lea.vmem [#allocation7], %s630_s14 }
  0x50   : > { %913 = dma.done.wait (%p1217_p7), %s249_s28, 512  }
  0x51   : > { %915 = vsyncadd (%p1217_p7), %s249_s28, 4294966784 }
  0x52   : > { %257 = sfence }
  0x53   : > { %s280_s18 = sld [smem:[#allocation2]]  ;;  %p1218_p10 = scmp.ne.s32.totalorder %s998_s22, 0 }
  0x54   : > { %s632_s24 = sld [smem:[#allocation2 + $0x1]] }
  0x55   : > { %s1139_s9 = sld [smem:[#allocation2 + $0x2]]  ;;  %290 = sbr.rel (%p1218_p10) target bundleno = 92 (0x5c), region = 52 }
  0x56   : > { %s1141_s11 = sld [smem:[#allocation2 + $0x3]] }
  0x57   : > { %s1143_s12 = sld [smem:[#allocation2 + $0x4]] }
  0x58   : > { %s1145_s13 = sld [smem:[#allocation2 + $0x5]] }
  0x59   : > { %s1147_s7 = sld [smem:[#allocation2 + $0x6]] }
  0x5a   : > { %v946_v0 = vmov 0.0  }
  0x5b   : > { %291 = vst [vmem:[#allocation9] sm:$0x1] %v946_v0  ;;  %292 = vst [vmem:[#allocation10] sm:$0x1] %v946_v0 }
  0x5c PF: > { %v640_v1 = vld [vmem:[%s1129_s21 + $0x10] sm:$0xff]  ;;  %v308_v2 = vstv %s280_s18  ;;  %v641_v3 = vld [vmem:[%s1129_s21 + $0x18] sm:$0xff]  ;;  %v354_v4 = vlaneseq  ;;  %v301_v6 = vld [vmem:[%s252_s17] sm:$0xff]  ;;  %p645_p13 = scmp.ne.s32.totalorder %s998_s22, 1 }
  0x5d   : > { %v331_v5 = vmul.f32 %v640_v1, %v308_v2  ;;  %v642_v7 = vld [vmem:[%s252_s17 + $0x8] sm:$0xff]  ;;  %v643_v9 = vld [vmem:[%s252_s17 + $0x10] sm:$0xff]  ;;  %v644_v11 = vld [vmem:[%s252_s17 + $0x18] sm:$0xff]  ;;  %v342_v12 = vmul.f32 %v641_v3, %v308_v2  ;;  %v360_v18 = vstv %s632_s24 }
  0x5e   : > { %v355_v8 = vshrl.u32 %v354_v4, 7  ;;  %v477_v10 = vadd.f32 %v642_v7, %v301_v6  ;;  %v1156_v13 = vld [vmem:[%s1207_s3] sm:$0x1]  ;;  %v478_v14 = vadd.f32 %v644_v11, %v643_v9  ;;  %v639_v36 = vld [vmem:[%s1129_s21 + $0x8] sm:$0xff] }
  0x5f   : > { %332 = vmax.xlane.f32.xlu0 %v331_v5  ;;  %v294_v23 = vld [vmem:[%s1129_s21] sm:$0xff]  ;;  %v320_v38 = vmul.f32 %v639_v36, %v308_v2 }
  0x60   : > { %v356_v15 = vsub.s32 0, %v355_v8  ;;  %v479_v16 = vadd.f32 %v478_v14, %v477_v10  ;;  %v309_v29 = vmul.f32 %v308_v2, %v294_v23 }
  0x62   : > { %v357_v17 = vrot.slane %v1156_v13, %v356_v15  ;;  %v481_v19 = vrot.slane %v479_v16, 4  ;;  %v480_v34 = vld [vmem:[#allocation10] sm:$0x1] }
  0x63   : > { %343 = vmax.xlane.f32.xlu0 %v342_v12 }
  0x64   : > { %v359_v20 = vsub.f32 %v301_v6, %v357_v17  ;;  %v384_v21 = vsub.f32 %v643_v9, %v357_v17  ;;  %v372_v22 = vsub.f32 %v642_v7, %v357_v17  ;;  %v482_v24 = vadd.f32 %v481_v19, %v479_v16 }
  0x65   : > { %v396_v30 = vsub.f32 %v644_v11, %v357_v17 }
  0x66   : > { %v361_v25 = vmul.f32 %v360_v18, %v359_v20  ;;  %v385_v26 = vmul.f32 %v384_v21, %v360_v18  ;;  %v483_v27 = vrot.slane %v482_v24, 2  ;;  %v373_v28 = vmul.f32 %v372_v22, %v360_v18 }
  0x67   : > { %v397_v33 = vmul.f32 %v396_v30, %v360_v18 }
  0x68   : > { %362 = vmax.xlane.f32.xlu1 %v361_v25  ;;  %386 = vmax.xlane.f32.xlu0 %v385_v26  ;;  %v484_v31 = vadd.f32 %v483_v27, %v482_v24 }
  0x6a   : > { %v485_v32 = vrot.slane %v484_v31, 1 }
  0x6c   : > { %374 = vmax.xlane.f32.xlu1 %v373_v28  ;;  %310 = vmax.xlane.f32.xlu0 %v309_v29  ;;  %v486_v35 = vadd.f32 %v485_v32, %v484_v31 }
  0x6e   : > { %v487_v37 = vadd.f32 %v486_v35, %v480_v34 }
  0x70   : > { %398 = vmax.xlane.f32.xlu1 %v397_v33  ;;  %488 = vst [vmem:[#allocation10] sm:$0x1] %v487_v37 }
  0x74   : > { %321 = vmax.xlane.f32.xlu1 %v320_v38 }
  0xe8   : > { %v333_v39 = vpop.xlane.xlu0 %332 }
  0xe9   : > { %v334_v40 = vsub.f32 %v331_v5, %v333_v39 }
  0xeb   : > { %v335_v41 = vmul.f32 1.442695, %v334_v40 }
  0xec   : > { %v344_v42 = vpop.xlane.xlu0 %343 }
  0xed   : > { %725 = vpow2.f32 %v335_v41  ;;  %v345_v43 = vsub.f32 %v342_v12, %v344_v42 }
  0xef   : > { %v346_v44 = vmul.f32 1.442695, %v345_v43 }
  0xf1   : > { %727 = vpow2.f32 %v346_v44  ;;  %v363_v45 = vpop.xlane.xlu1 %362  ;;  %v387_v46 = vpop.xlane.xlu0 %386 }
  0xf2   : > { %v364_v47 = vsub.f32 %v361_v25, %v363_v45  ;;  %v388_v48 = vsub.f32 %v385_v26, %v387_v46 }
  0xf4   : > { %v365_v49 = vmul.f32 1.442695, %v364_v47  ;;  %v389_v50 = vmul.f32 1.442695, %v388_v48 }
  0xf5   : > { %v375_v51 = vpop.xlane.xlu1 %374  ;;  %v311_v52 = vpop.xlane.xlu0 %310 }
  0xf6   : > { %729 = vpow2.f32 %v365_v49  ;;  %v376_v53 = vsub.f32 %v373_v28, %v375_v51  ;;  %v312_v54 = vsub.f32 %v309_v29, %v311_v52  ;;  %v411_v49 = vstv %s1139_s9 }
  0xf7   : > { %731 = vpow2.f32 %v389_v50 }
  0xf8   : > { %v377_v55 = vmul.f32 1.442695, %v376_v53  ;;  %v313_v56 = vmul.f32 1.442695, %v312_v54 }
  0xf9   : > { %v399_v57 = vpop.xlane.xlu1 %398 }
  0xfa   : > { %v726_v58 = vpop.eup %725  ;;  %733 = vpow2.f32 %v377_v55  ;;  %v400_v59 = vsub.f32 %v397_v33, %v399_v57 }
  0xfb   : > { %735 = vpow2.f32 %v313_v56  ;;  %v337_v60 = vmul.f32 %v726_v58, %v726_v58 }
  0xfc   : > { %v401_v61 = vmul.f32 1.442695, %v400_v59 }
  0xfd   : > { %338 = vadd.xlane.f32.xlu0 %v337_v60  ;;  %v322_v62 = vpop.xlane.xlu1 %321 }
  0xfe   : > { %v728_v63 = vpop.eup %727  ;;  %737 = vpow2.f32 %v401_v61  ;;  %v323_v0 = vsub.f32 %v320_v38, %v322_v62 }
  0xff   : > { %v348_v1 = vmul.f32 %v728_v63, %v728_v63 }
 0x100   : > { %v324_v2 = vmul.f32 1.442695, %v323_v0 }
 0x101   : > { %349 = vadd.xlane.f32.xlu1 %v348_v1 }
 0x102   : > { %739 = vpow2.f32 %v324_v2 }
 0x103   : > { %v730_v3 = vpop.eup %729 }
 0x104   : > { %v732_v4 = vpop.eup %731  ;;  %v367_v5 = vmul.f32 %v730_v3, %v730_v3 }
 0x105   : > { %v391_v6 = vmul.f32 %v732_v4, %v732_v4 }
 0x106   : > { %368 = vadd.xlane.f32.xlu0 %v367_v5 }
 0x107   : > { %v734_v7 = vpop.eup %733 }
 0x108   : > { %v736_v8 = vpop.eup %735  ;;  %v379_v9 = vmul.f32 %v734_v7, %v734_v7 }
 0x109   : > { %v315_v10 = vmul.f32 %v736_v8, %v736_v8 }
 0x10a   : > { %392 = vadd.xlane.f32.xlu0 %v391_v6  ;;  %380 = vadd.xlane.f32.xlu1 %v379_v9 }
 0x10b   : > { %v738_v11 = vpop.eup %737 }
 0x10c   : > { %v403_v12 = vmul.f32 %v738_v11, %v738_v11 }
 0x10e   : > { %316 = vadd.xlane.f32.xlu0 %v315_v10  ;;  %404 = vadd.xlane.f32.xlu1 %v403_v12 }
 0x10f   : > { %v740_v14 = vpop.eup %739 }
 0x110   : > { %v326_v15 = vmul.f32 %v740_v14, %v740_v14 }
 0x112   : > { %327 = vadd.xlane.f32.xlu1 %v326_v15 }
 0x186   : > { %v339_v16 = vpop.xlane.xlu0 %338 }
 0x18a   : > { %v350_v17 = vpop.xlane.xlu1 %349 }
 0x18b   : > { %741 = vrsqrt.f32 %v350_v17 }
 0x18f   : > { %v369_v18 = vpop.xlane.xlu0 %368 }
 0x190   : > { %743 = vrsqrt.f32 %v369_v18 }
 0x191   : > { %745 = vrsqrt.f32 %v339_v16 }
 0x193   : > { %v393_v19 = vpop.xlane.xlu0 %392  ;;  %v381_v20 = vpop.xlane.xlu1 %380 }
 0x194   : > { %747 = vrsqrt.f32 %v393_v19 }
 0x195   : > { %749 = vrsqrt.f32 %v381_v20 }
 0x197   : > { %v317_v21 = vpop.xlane.xlu0 %316  ;;  %v405_v22 = vpop.xlane.xlu1 %404 }
 0x198   : > { %751 = vrsqrt.f32 %v317_v21  ;;  %v742_v23 = vpop.eup %741 }
 0x199   : > { %753 = vrsqrt.f32 %v405_v22  ;;  %v352_v26 = vmul.f32 %v742_v23, %v728_v63 }
 0x19b   : > { %v328_v24 = vpop.xlane.xlu1 %327 }
 0x19c   : > { %755 = vrsqrt.f32 %v328_v24 }
 0x19d   : > { %v744_v25 = vpop.eup %743 }
 0x19e   : > { %v371_v27 = vmul.f32 %v744_v25, %v730_v3  ;;  %v746_v28 = vpop.eup %745 }
 0x19f   : > { %v341_v33 = vmul.f32 %v746_v28, %v726_v58 }
 0x1a0   : > { %v417_v29 = vmul.f32 %v371_v27, %v352_v26 }
 0x1a1   : > { %v748_v30 = vpop.eup %747 }
 0x1a2   : > { %v750_v31 = vpop.eup %749  ;;  %418 = vadd.xlane.f32.xlu1 %v417_v29  ;;  %v395_v32 = vmul.f32 %v748_v30, %v732_v4 }
 0x1a3   : > { %v383_v34 = vmul.f32 %v750_v31, %v734_v7 }
 0x1a4   : > { %v413_v35 = vmul.f32 %v395_v32, %v371_v27 }
 0x1a5   : > { %v752_v36 = vpop.eup %751  ;;  %v446_v37 = vmul.f32 %v383_v34, %v341_v33 }
 0x1a6   : > { %v754_v38 = vpop.eup %753  ;;  %414 = vadd.xlane.f32.xlu0 %v413_v35  ;;  %v319_v39 = vmul.f32 %v752_v36, %v736_v8  ;;  %v474_v36 = vld [vmem:[#allocation9] sm:$0x1] }
 0x1a7   : > { %447 = vadd.xlane.f32.xlu1 %v446_v37  ;;  %v407_v40 = vmul.f32 %v754_v38, %v738_v11 }
 0x1a8   : > { %v438_v41 = vmul.f32 %v383_v34, %v319_v39 }
 0x1a9   : > { %v756_v42 = vpop.eup %755  ;;  %v442_v43 = vmul.f32 %v407_v40, %v383_v34 }
 0x1aa   : > { %v330_v44 = vmul.f32 %v756_v42, %v740_v14 }
 0x1ab   : > { %439 = vadd.xlane.f32.xlu1 %v438_v41  ;;  %443 = vadd.xlane.f32.xlu0 %v442_v43 }
 0x1ac   : > { %v408_v45 = vmul.f32 %v371_v27, %v330_v44 }
 0x1af   : > { %409 = vadd.xlane.f32.xlu0 %v408_v45 }
 0x22b   : > { %v419_v46 = vpop.xlane.xlu1 %418 }
 0x22c   : > { %v420_v55 = vmul.f32 %v419_v46, %v411_v49 }
 0x22f   : > { %v415_v47 = vpop.xlane.xlu0 %414 }
 0x230   : > { %v448_v48 = vpop.xlane.xlu1 %447  ;;  %v416_v52 = vmul.f32 %v415_v47, %v411_v49 }
 0x231   : > { %v449_v53 = vmul.f32 %v448_v48, %v411_v49 }
 0x232   : > { %v421_v59 = vmax.f32 %v416_v52, %v420_v55 }
 0x234   : > { %v444_v50 = vpop.xlane.xlu0 %443  ;;  %v440_v51 = vpop.xlane.xlu1 %439 }
 0x235   : > { %v445_v54 = vmul.f32 %v444_v50, %v411_v49  ;;  %v441_v57 = vmul.f32 %v440_v51, %v411_v49 }
 0x237   : > { %v450_v56 = vmax.f32 %v445_v54, %v449_v53 }
 0x238   : > { %v410_v58 = vpop.xlane.xlu0 %409 }
 0x239   : > { %v451_v60 = vmax.f32 %v441_v57, %v450_v56  ;;  %v412_v61 = vmul.f32 %v411_v49, %v410_v58 }
 0x23b   : > { %v452_v62 = vsub.f32 %v441_v57, %v451_v60  ;;  %v455_v63 = vsub.f32 %v445_v54, %v451_v60  ;;  %v459_v0 = vsub.f32 %v449_v53, %v451_v60  ;;  %v422_v1 = vmax.f32 %v412_v61, %v421_v59 }
 0x23d   : > { %v453_v2 = vmul.f32 1.442695, %v452_v62  ;;  %v456_v3 = vmul.f32 1.442695, %v455_v63  ;;  %v460_v4 = vmul.f32 1.442695, %v459_v0  ;;  %v423_v5 = vsub.f32 %v412_v61, %v422_v1 }
 0x23e   : > { %v426_v6 = vsub.f32 %v416_v52, %v422_v1  ;;  %v430_v7 = vsub.f32 %v420_v55, %v422_v1 }
 0x23f   : > { %757 = vpow2.f32 %v453_v2  ;;  %v424_v8 = vmul.f32 1.442695, %v423_v5 }
 0x240   : > { %759 = vpow2.f32 %v456_v3  ;;  %v427_v9 = vmul.f32 1.442695, %v426_v6  ;;  %v431_v10 = vmul.f32 1.442695, %v430_v7 }
 0x241   : > { %761 = vpow2.f32 %v460_v4 }
 0x242   : > { %763 = vpow2.f32 %v424_v8 }
 0x243   : > { %765 = vpow2.f32 %v427_v9 }
 0x244   : > { %767 = vpow2.f32 %v431_v10 }
 0x24c   : > { %v758_v11 = vpop.eup %757 }
 0x24d   : > { %v760_v12 = vpop.eup %759 }
 0x24e   : > { %v762_v14 = vpop.eup %761  ;;  %v458_v15 = vadd.f32 %v760_v12, %v758_v11 }
 0x24f   : > { %v764_v16 = vpop.eup %763 }
 0x250   : > { %v766_v17 = vpop.eup %765  ;;  %v462_v18 = vadd.f32 %v762_v14, %v458_v15 }
 0x251   : > { %v429_v19 = vadd.f32 %v766_v17, %v764_v16  ;;  %v768_v20 = vpop.eup %767 }
 0x252   : > { %769 = vlog2.f32 %v462_v18 }
 0x253   : > { %v433_v21 = vadd.f32 %v768_v20, %v429_v19 }
 0x255   : > { %771 = vlog2.f32 %v433_v21 }
 0x25f   : > { %v770_v22 = vpop.eup %769 }
 0x260   : > { %v464_v23 = vmul.f32 0.6931472, %v770_v22 }
 0x262   : > { %v772_v24 = vpop.eup %771  ;;  %v465_v25 = vadd.f32 %v464_v23, %v451_v60 }
 0x263   : > { %v435_v26 = vmul.f32 0.6931472, %v772_v24 }
 0x264   : > { %v466_v28 = vsub.f32 %v465_v25, %v441_v57 }
 0x265   : > { %v436_v27 = vadd.f32 %v435_v26, %v422_v1 }
 0x267   : > { %v437_v29 = vsub.f32 %v436_v27, %v412_v61 }
 0x269   : > { %v467_v30 = vadd.f32 %v466_v28, %v437_v29 }
 0x26b   : > { %v468_v31 = vrot.slane %v467_v30, 4 }
 0x26d   : > { %v469_v32 = vadd.f32 %v468_v31, %v467_v30 }
 0x26f   : > { %v470_v33 = vrot.slane %v469_v32, 2 }
 0x271   : > { %v471_v34 = vadd.f32 %v470_v33, %v469_v32 }
 0x273   : > { %v472_v35 = vrot.slane %v471_v34, 1 }
 0x275   : > { %v473_v37 = vadd.f32 %v472_v35, %v471_v34  ;;  %492 = sbr.rel (%p645_p13) target bundleno = 644 (0x284), region = 56 }
 0x277   : > { %v475_v38 = vadd.f32 %v474_v36, %v473_v37 }
 0x279   : > { %476 = vst [vmem:[#allocation9] sm:$0x1] %v475_v38 }
 0x27a   : > { %v494_v40 = vstv %s1145_s13  ;;  %v497_v41 = vld [vmem:[#allocation10] sm:$0x1]  ;;  %v498_v42 = vstv %s1147_s7  ;;  %v500_v43 = vstv %s1141_s11  ;;  %v502_v44 = vstv %s1143_s12 }
 0x27b   : > { %v499_v46 = vmul.f32 %v498_v42, %v497_v41  ;;  %v501_v47 = vmul.f32 %v500_v43, %v1156_v13 }
 0x27d   : > { %v503_v48 = vmul.f32 %v502_v44, %v499_v46 }
 0x27f   : > { %v504_v49 = vadd.f32 %v503_v48, %v501_v47 }
 0x280   : > { %v493_v39 = vld [vmem:[#allocation9] sm:$0x1] }
 0x281   : > { %v495_v45 = vmul.f32 %v494_v40, %v493_v39  ;;  %505 = vst [vmem:[#allocation10] sm:$0x1] %v504_v49 }
 0x283   : > { %496 = vst [vmem:[#allocation9] sm:$0x1] %v495_v45 }
 0x284 PF: > { %p682_p11 = scmp.eq.s32.totalorder %s998_s22, 1  ;;  %s947_s16 = smov [#allocation9]  }
 0x285   : > { %s513_s29 = sshll.u32 %s947_s16, 4  ;;  %s948_s6 = smov [#allocation10]   ;;  %s514_s29 = int_to_ptr.vmem [resolvable:$true] %s513_s29 }
 0x286   : > { %s524_s25 = sshll.u32 %s948_s6, 4  ;;  %s840_s8 = scalar_lea.vmem %s514_s29, 16  ;;  %s525_s25 = int_to_ptr.vmem [resolvable:$true] %s524_s25 }
 0x287   : > { %p841_p12 = scmp.ne.s32.totalorder %s514_s29, %s840_s8  ;;  %s846_s10 = scalar_lea.vmem %s514_s29, 32 }
 0x288   : > { %p847_p3 = scmp.lt.s32.totalorder %s514_s29, %s514_s29  ;;  %p848_p6 = scmp.lt.s32.totalorder %s846_s10, %s840_s8 }
 0x289   : > { %p842_p0 = pnand %p841_p12, %p682_p11 }
 0x28a   : > { %p849_p5 = por %p848_p6, %p847_p3 }
 0x28b   : > { %p843_p1 = pneg %p842_p0 }
 0x28d   : > { %p850_p8 = pnand %p849_p5, %p843_p1 }
 0x28f   : > { %853 = shalt.err (!%p850_p8)
}
 0x290   : > { %661 = dma.vmem_to_hbm [thread:$0]  (%p682_p11), %s514_s29, 16, %s1208_s4, [#allocation4]  }
 0x291   : > { %s864_s21 = scalar_lea.vmem %s525_s25, 16  ;;  %s870_s28 = scalar_lea.vmem %s525_s25, 32 }
 0x292   : > { %p865_p4 = scmp.ne.s32.totalorder %s525_s25, %s864_s21  ;;  %p871_p7 = scmp.lt.s32.totalorder %s525_s25, %s525_s25 }
 0x293   : > { %p872_p10 = scmp.lt.s32.totalorder %s870_s28, %s864_s21 }
 0x294   : > { %p866_p2 = pnand %p865_p4, %p682_p11 }
 0x295   : > { %p873_p13 = por %p872_p10, %p871_p7 }
 0x296   : > { %p867_p9 = pneg %p866_p2 }
 0x298   : > { %p874_p12 = pnand %p873_p13, %p867_p9 }
 0x29a   : > { %877 = shalt.err (!%p874_p12)
}
 0x29b   : > { %663 = dma.vmem_to_hbm [thread:$0]  (%p682_p11), %s525_s25, 16, %s1209_s5, [#allocation11]  }
 0x29c   : > { %917 = dma.done.wait (%p682_p11), [#allocation4], 16  }
 0x29d   : > { %919 = vsyncadd (%p682_p11), [#allocation4], 4294967280 }
 0x29e   : > { %921 = dma.done.wait (%p682_p11), [#allocation11], 16  }
 0x29f   : > { %923 = vsyncadd (%p682_p11), [#allocation11], 4294967280 }
 0x2a0 PF: > { %p22_p0 = scmp.ge.s32.totalorder %s1001_s23, 4   ;;  %s1219_s18 = smov %s930_s19 }
 0x2a1   : > { %s1220_s19 = smov %s934_s20  ;;  %s1221_s20 = smov %s1011_s26 }
 0x2a2   : > { %s1222_s21 = smov %s1001_s23  ;;  %24 = sbr.rel (!%p22_p0) target bundleno = 8 (0x8), region = 113 }
 0x2a7   :  { %541 = vsyncpa [#allocation3], 1 }
 0x2a8   :  { %543 = vsyncpa [#allocation3 + $0x1], 1 }
 0x2a9   :  { %544 = vsyncpa [#allocation8], 1 }
 0x2aa   :  { %546 = vsyncpa [#allocation8 + $0x1], 1 }
 0x2ab   :  { %547 = vsyncpa [#allocation4], 1 }
 0x2ac   :  { %549 = vsyncpa [#allocation4 + $0x1], 1 }
 0x2ad   :  { %550 = vsyncpa [#allocation11], 1 }
 0x2ae   :  { %551 = vsyncpa [#allocation5], 1 }
 0x2af   :  { %553 = vsyncpa [#allocation5 + $0x1], 1 }

</bundles_post_ra>
